<compile_context>
chip_gen: v7x
topology: tpu7x:2x2x1
jax: 0.10.0
libtpu: 0.0.40
codegen_flags: <defaults>
</compile_context>

<pallas_src>
import jax
import jax.numpy as jnp
from jax.experimental import pallas as pl
from jax.experimental.pallas import tpu as pltpu


def _mlp_edge_kernel(src_ref, dst_ref, ht_ref, w1_ref, b1_ref, w2_ref, b2_ref,
                     out_ref):
    # Per grid step:
    #   src_ref, dst_ref : [1, T]   int32 endpoint indices (T = edge_tile)
    #   ht_ref           : [H, N]   node features, transposed (VMEM resident)
    #   w1_ref           : [H, 2H]  torch layout (out, in)
    #   b1_ref           : [H, 1]
    #   w2_ref           : [H, 1]   torch W2 transposed
    #   b2_ref           : [1]      SMEM scalar
    #   out_ref          : [1, T]   lane-dense scores
    n_nodes = ht_ref.shape[1]
    tile = src_ref.shape[1]

    # Exact one-hot gather via the MXU: onehot[n, e] = (n == idx[e]).
    node_iota = jax.lax.broadcasted_iota(jnp.int32, (n_nodes, tile), 0)
    oh_src = (node_iota == src_ref[...]).astype(jnp.float32)          # [N, T]
    oh_dst = (node_iota == dst_ref[...]).astype(jnp.float32)          # [N, T]
    hs_t = jnp.dot(ht_ref[...], oh_src, preferred_element_type=jnp.float32)
    hd_t = jnp.dot(ht_ref[...], oh_dst, preferred_element_type=jnp.float32)

    # concat([h_src, h_dst]) along the feature (sublane) axis -> one K=2H matmul.
    hcat_t = jnp.concatenate([hs_t, hd_t], axis=0)                    # [2H, T]
    z_t = jnp.dot(w1_ref[...], hcat_t, preferred_element_type=jnp.float32)
    z_t = jnp.maximum(z_t + b1_ref[...], 0.0)                         # [H, T]

    # Output layer: width-1 matmul replaced by VPU mul + sublane (XLU) reduce.
    s = jnp.sum(z_t * w2_ref[...], axis=0, keepdims=True) + b2_ref[0]  # [1, T]
    out_ref[...] = s.astype(out_ref.dtype)


def mlp_predictor_scores(h, src, dst, params, *, edge_tile=512):
    """Per-edge scores of MLPPredictor.

    h        : [N, H] node features
    src, dst : [E]    edge endpoint indices (integer)
    params   : dict with w1 [H, 2H], b1 [H], w2 [1, H], b2 [1]  (torch layout)
    """
    n_nodes, h_feats = h.shape
    n_edges = src.shape[0]

    num_tiles = pl.cdiv(n_edges, edge_tile)
    e_pad = num_tiles * edge_tile

    # Pad the edge list (index 0 is always valid); padded scores are sliced off.
    src_p = jnp.pad(src.astype(jnp.int32), (0, e_pad - n_edges)).reshape(1, e_pad)
    dst_p = jnp.pad(dst.astype(jnp.int32), (0, e_pad - n_edges)).reshape(1, e_pad)

    # Feature-major operands (features on sublanes, edges on lanes).
    h_t = h.T.astype(jnp.float32)                                  # [H, N]
    w1 = params["w1"].astype(jnp.float32)                          # [H, 2H]
    b1 = params["b1"].astype(jnp.float32).reshape(h_feats, 1)      # [H, 1]
    w2 = params["w2"].astype(jnp.float32).reshape(h_feats, 1)      # [H, 1]
    b2 = params["b2"].astype(jnp.float32).reshape(1)               # [1] (SMEM)

    out = pl.pallas_call(
        _mlp_edge_kernel,
        out_shape=jax.ShapeDtypeStruct((1, e_pad), jnp.float32),
        grid_spec=pltpu.PrefetchScalarGridSpec(
            num_scalar_prefetch=0,
            grid=(num_tiles,),
            in_specs=[
                pl.BlockSpec((1, edge_tile), lambda i: (0, i)),          # src idx
                pl.BlockSpec((1, edge_tile), lambda i: (0, i)),          # dst idx
                pl.BlockSpec((h_feats, n_nodes), lambda i: (0, 0)),      # h^T (resident)
                pl.BlockSpec((h_feats, 2 * h_feats), lambda i: (0, 0)),  # W1
                pl.BlockSpec((h_feats, 1), lambda i: (0, 0)),            # b1
                pl.BlockSpec((h_feats, 1), lambda i: (0, 0)),            # W2^T
                pl.BlockSpec(memory_space=pltpu.MemorySpace.SMEM),       # b2 scalar
            ],
            out_specs=pl.BlockSpec((1, edge_tile), lambda i: (0, i)),    # lane-dense
        ),
        compiler_params=pltpu.CompilerParams(
            dimension_semantics=("parallel",)),
    )(src_p, dst_p, h_t, w1, b1, w2, b2)

    return out[0, :n_edges]


def _reference_scores(h, src, dst, params):
    hcat = jnp.concatenate([h[src], h[dst]], axis=1)
    z = jnp.maximum(hcat @ params["w1"].T + params["b1"], 0.0)
    return (z @ params["w2"].T + params["b2"])[:, 0]


if __name__ == "__main__":
    h_feats = 32
    n_nodes = 64
    n_edges = 2000   # deliberately NOT a multiple of edge_tile -> exercises padding
                     # (pads to 2048 -> grid of 4 x 512-edge tiles, >=2 steps for v7x)

    key = jax.random.PRNGKey(0)
    k_h, k_w1, k_b1, k_w2, k_b2, k_src, k_dst = jax.random.split(key, 7)

    # Node features.
    h = jax.random.normal(k_h, (n_nodes, h_feats), dtype=jnp.float32)

    # Edge list (synthetic graph).
    src = jax.random.randint(k_src, (n_edges,), 0, n_nodes, dtype=jnp.int32)
    dst = jax.random.randint(k_dst, (n_edges,), 0, n_nodes, dtype=jnp.int32)

    # Deterministic parameter init (matches torch nn.Linear shapes).
    params = {
        "w1": jax.random.normal(k_w1, (h_feats, 2 * h_feats), jnp.float32) * 0.1,
        "b1": jax.random.normal(k_b1, (h_feats,), jnp.float32) * 0.1,
        "w2": jax.random.normal(k_w2, (1, h_feats), jnp.float32) * 0.1,
        "b2": jax.random.normal(k_b2, (1,), jnp.float32) * 0.1,
    }

    scores = mlp_predictor_scores(h, src, dst, params)
    scores = jax.block_until_ready(scores)

    ref = _reference_scores(h, src, dst, params)
    assert scores.shape == (n_edges,)
    assert jnp.allclose(scores, ref, atol=1e-4, rtol=1e-4), "mismatch vs reference"

    print("KERNEL_OK")
</pallas_src>

<mosaic_0001>
module attributes {stable_mosaic.version = 11 : i64} {
  func.func @_mlp_edge_kernel(%arg0: i32, %arg1: memref<1x512xi32, #tpu.memory_space<vmem>>, %arg2: memref<1x512xi32, #tpu.memory_space<vmem>>, %arg3: memref<32x64xf32, #tpu.memory_space<vmem>>, %arg4: memref<32x64xf32, #tpu.memory_space<vmem>>, %arg5: memref<32x1xf32, #tpu.memory_space<vmem>>, %arg6: memref<32x1xf32, #tpu.memory_space<vmem>>, %arg7: memref<1xf32, #tpu.memory_space<smem>>, %arg8: memref<1x512xf32, #tpu.memory_space<vmem>>) attributes {dimension_semantics = [#tpu.dimension_semantics<parallel>], iteration_bounds = array<i64: 4>, scalar_prefetch = 0 : i64, scratch_operands = 0 : i64, tpu.core_type = #tpu.core_type<tc>, window_params = [{transform_indices = @transform_0, window_bounds = array<i64: 1, 512>}, {transform_indices = @transform_1, window_bounds = array<i64: 1, 512>}, {pipeline_mode = #tpu.pipeline_mode<synchronous>, transform_indices = @transform_2, window_bounds = array<i64: 32, 64>}, {pipeline_mode = #tpu.pipeline_mode<synchronous>, transform_indices = @transform_3, window_bounds = array<i64: 32, 64>}, {pipeline_mode = #tpu.pipeline_mode<synchronous>, transform_indices = @transform_4, window_bounds = array<i64: 32, 1>}, {pipeline_mode = #tpu.pipeline_mode<synchronous>, transform_indices = @transform_5, window_bounds = array<i64: 32, 1>}, {transform_indices = @transform_6, window_bounds = array<i64: 1>}, {transform_indices = @transform_7, window_bounds = array<i64: 1, 512>}]} {
    %0 = tpu.iota {dimensions = array<i32: 0>} : vector<64x512xi32>
    %c0 = arith.constant 0 : index
    %c0_0 = arith.constant 0 : index
    %1 = vector.load %arg1[%c0, %c0_0] : memref<1x512xi32, #tpu.memory_space<vmem>>, vector<1x512xi32>
    %2 = vector.broadcast %1 : vector<1x512xi32> to vector<64x512xi32>
    %3 = arith.cmpi eq, %0, %2 : vector<64x512xi32>
    %4 = arith.extui %3 : vector<64x512xi1> to vector<64x512xi32>
    %5 = arith.sitofp %4 : vector<64x512xi32> to vector<64x512xf32>
    %c0_1 = arith.constant 0 : index
    %c0_2 = arith.constant 0 : index
    %6 = vector.load %arg2[%c0_1, %c0_2] : memref<1x512xi32, #tpu.memory_space<vmem>>, vector<1x512xi32>
    %7 = vector.broadcast %6 : vector<1x512xi32> to vector<64x512xi32>
    %8 = arith.cmpi eq, %0, %7 : vector<64x512xi32>
    %9 = arith.extui %8 : vector<64x512xi1> to vector<64x512xi32>
    %10 = arith.sitofp %9 : vector<64x512xi32> to vector<64x512xf32>
    %c0_3 = arith.constant 0 : index
    %c0_4 = arith.constant 0 : index
    %11 = vector.load %arg3[%c0_3, %c0_4] : memref<32x64xf32, #tpu.memory_space<vmem>>, vector<32x64xf32>
    %cst = arith.constant dense<0.000000e+00> : vector<32x512xf32>
    %12 = tpu.matmul %11, %5, %cst {dimension_numbers = #tpu.dot_dimension_numbers<[1], [0], [0], [1], [0, 0, 1, 1], [], []>} : vector<32x64xf32>, vector<64x512xf32>, vector<32x512xf32> -> vector<32x512xf32>
    %c0_5 = arith.constant 0 : index
    %c0_6 = arith.constant 0 : index
    %13 = vector.load %arg3[%c0_5, %c0_6] : memref<32x64xf32, #tpu.memory_space<vmem>>, vector<32x64xf32>
    %cst_7 = arith.constant dense<0.000000e+00> : vector<32x512xf32>
    %14 = tpu.matmul %13, %10, %cst_7 {dimension_numbers = #tpu.dot_dimension_numbers<[1], [0], [0], [1], [0, 0, 1, 1], [], []>} : vector<32x64xf32>, vector<64x512xf32>, vector<32x512xf32> -> vector<32x512xf32>
    %15 = tpu.concatenate %12, %14 in 0 : vector<32x512xf32>, vector<32x512xf32> -> vector<64x512xf32>
    %c0_8 = arith.constant 0 : index
    %c0_9 = arith.constant 0 : index
    %16 = vector.load %arg4[%c0_8, %c0_9] : memref<32x64xf32, #tpu.memory_space<vmem>>, vector<32x64xf32>
    %cst_10 = arith.constant dense<0.000000e+00> : vector<32x512xf32>
    %17 = tpu.matmul %16, %15, %cst_10 {dimension_numbers = #tpu.dot_dimension_numbers<[1], [0], [0], [1], [0, 0, 1, 1], [], []>} : vector<32x64xf32>, vector<64x512xf32>, vector<32x512xf32> -> vector<32x512xf32>
    %c0_11 = arith.constant 0 : index
    %c0_12 = arith.constant 0 : index
    %18 = vector.load %arg5[%c0_11, %c0_12] : memref<32x1xf32, #tpu.memory_space<vmem>>, vector<32x1xf32>
    %19 = vector.broadcast %18 : vector<32x1xf32> to vector<32x512xf32>
    %20 = arith.addf %17, %19 : vector<32x512xf32>
    %cst_13 = arith.constant 0.000000e+00 : f32
    %21 = vector.broadcast %cst_13 : f32 to vector<32x512xf32>
    %22 = arith.maximumf %20, %21 : vector<32x512xf32>
    %c0_14 = arith.constant 0 : index
    %c0_15 = arith.constant 0 : index
    %23 = vector.load %arg6[%c0_14, %c0_15] : memref<32x1xf32, #tpu.memory_space<vmem>>, vector<32x1xf32>
    %24 = vector.broadcast %23 : vector<32x1xf32> to vector<32x512xf32>
    %25 = arith.mulf %22, %24 : vector<32x512xf32>
    %cst_16 = arith.constant dense<0.000000e+00> : vector<512xf32>
    %26 = vector.multi_reduction <add>, %25, %cst_16 [0] : vector<32x512xf32> to vector<512xf32>
    %27 = vector.shape_cast %26 : vector<512xf32> to vector<1x512xf32>
    %c0_17 = arith.constant 0 : index
    %28 = memref.load %arg7[%c0_17] : memref<1xf32, #tpu.memory_space<smem>>
    %29 = vector.broadcast %28 : f32 to vector<1x512xf32>
    %30 = arith.addf %27, %29 : vector<1x512xf32>
    %c0_18 = arith.constant 0 : index
    %c0_19 = arith.constant 0 : index
    %31 = vector.load %arg8[%c0_18, %c0_19] : memref<1x512xf32, #tpu.memory_space<vmem>>, vector<1x512xf32>
    tpu.vector_store %arg8[%c0_18, %c0_19], %30 {strides = array<i32>} : memref<1x512xf32, #tpu.memory_space<vmem>>, vector<1x512xf32>,
    return
  }
  func.func @transform_0(%arg0: i32) -> (i32, i32) {
    %c0_i32 = arith.constant 0 : i32
    %c0_i32_0 = arith.constant 0 : i32
    return %c0_i32, %arg0 : i32, i32
  }
  func.func @transform_1(%arg0: i32) -> (i32, i32) {
    %c0_i32 = arith.constant 0 : i32
    %c0_i32_0 = arith.constant 0 : i32
    return %c0_i32, %arg0 : i32, i32
  }
  func.func @transform_2(%arg0: i32) -> (i32, i32) {
    %c0_i32 = arith.constant 0 : i32
    %c0_i32_0 = arith.constant 0 : i32
    %c0_i32_1 = arith.constant 0 : i32
    return %c0_i32, %c0_i32_0 : i32, i32
  }
  func.func @transform_3(%arg0: i32) -> (i32, i32) {
    %c0_i32 = arith.constant 0 : i32
    %c0_i32_0 = arith.constant 0 : i32
    %c0_i32_1 = arith.constant 0 : i32
    return %c0_i32, %c0_i32_0 : i32, i32
  }
  func.func @transform_4(%arg0: i32) -> (i32, i32) {
    %c0_i32 = arith.constant 0 : i32
    %c0_i32_0 = arith.constant 0 : i32
    %c0_i32_1 = arith.constant 0 : i32
    return %c0_i32, %c0_i32_0 : i32, i32
  }
  func.func @transform_5(%arg0: i32) -> (i32, i32) {
    %c0_i32 = arith.constant 0 : i32
    %c0_i32_0 = arith.constant 0 : i32
    %c0_i32_1 = arith.constant 0 : i32
    return %c0_i32, %c0_i32_0 : i32, i32
  }
  func.func @transform_6(%arg0: i32) -> i32 {
    %c0_i32 = arith.constant 0 : i32
    %c0_i32_0 = arith.constant 0 : i32
    return %c0_i32 : i32
  }
  func.func @transform_7(%arg0: i32) -> (i32, i32) {
    %c0_i32 = arith.constant 0 : i32
    %c0_i32_0 = arith.constant 0 : i32
    return %c0_i32, %arg0 : i32, i32
  }
}

</mosaic_0001>

<bundles_post_ra>
// kernel: tpu_custom_call.1
= control target key start
LH: loop header
LB: loop body
LE: loop exit
PB: predicated region body
PF: predicated region fallthrough
CT: control target
= control target key end

     0   :  { %s2473_s0 = inlined_call_operand.hbm [shape: s32[1,2048], index: 0, kind: input, shape index: {}]   ;;  %s2474_s1 = inlined_call_operand.hbm [shape: s32[1,2048], index: 1, kind: input, shape index: {}]   ;;  %s2475_s2 = inlined_call_operand.vmem [shape: f32[32,64], index: 2, kind: input, shape index: {}]   ;;  %s2476_s3 = inlined_call_operand.vmem [shape: f32[32,64], index: 3, kind: input, shape index: {}]   ;;  %s2477_s4 = inlined_call_operand.vmem [shape: f32[32,1], index: 4, kind: input, shape index: {}]   ;;  %s2478_s5 = inlined_call_operand.vmem [shape: f32[32,1], index: 5, kind: input, shape index: {}]   ;;  %s2479_s6 = inlined_call_operand.<no memory space> [shape: f32[1], index: 6, kind: input, shape index: {}]   ;;  %s2480_s7 = inlined_call_operand.hbm [shape: f32[1,2048], index: 7, kind: output, shape index: {}]  }
   0x1   :  { %12 = sst [smem:[#allocation2]] %s2479_s6 }
   0x2   :  { %13 = vsyncpa [#allocation4], 0 }
   0x3   :  { %15 = vsyncpa [#allocation4 + $0x1], 0 }
   0x4   :  { %16 = vsyncpa [#allocation7], 0 }
   0x5   :  { %18 = vsyncpa [#allocation7 + $0x1], 0 }
   0x6   :  { %19 = vsyncpa [#allocation5], 0 }
   0x7   :  { %21 = vsyncpa [#allocation5 + $0x1], 0  ;;  %s1911_s26 = smov 0   ;;  %s1913_s27 = smov 0  }
   0x8   :  { %s1915_s28 = smov 0   ;;  %s1917_s29 = smov 0  }
   0x9 LB: > { %s1932_s6 = sadd.s32 4294967295, %s1859_s29   ;;  %s1403_s30 = sadd.s32 4294967294, %s1859_s29   ;;  %s1859_s29 = sphi %s1917_s29, %s2498_s29   ;;  %s1855_s28 = sphi %s1915_s28, %s2497_s28   ;;  %s1851_s27 = sphi %s1913_s27, %s2496_s27   ;;  %s1847_s26 = sphi %s1911_s26, %s2495_s26  }
   0xa   : > { %s1936_s8 = sadd.s32 1, %s1859_s29   ;;  %s34_s9 = sadd.s32 1, %s1855_s28 }
   0xb   : > { %s31_s10 = ssub.s32 %s1859_s29, %s1936_s8  ;;  %p41_p0 = scmp.ne.s32.totalorder %s1855_s28, %s1851_s27 }
   0xc   : > { %p32_p1 = scmp.eq.s32.totalorder %s31_s10, 0  ;;  %p42_p2 = scmp.eq.s32.totalorder %s1859_s29, 0 }
   0xd   : > { %p47_p3 = scmp.ne.s32.totalorder %s1851_s27, %s1847_s26  ;;  %p48_p4 = scmp.eq.s32.totalorder %s1932_s6, 0 }
   0xe   : > { %s1948_s11 = scalar_select %p32_p1, %s1855_s28, %s34_s9  }
   0xf   : > { %p1950_p5 = por %p42_p2, %p41_p0  ;;  %p1954_p6 = por %p48_p4, %p47_p3 }
  0x10   : > { %p202_p7 = scmp.eq.s32.totalorder %s1932_s6, 3  ;;  %p208_p8 = scmp.eq.s32.totalorder %s1403_s30, 3 }
  0x11   : > { %s2484_s13 = scalar_select %p1954_p6, 1, 0 }
  0x12   : > { %p1689_p9 = scmp.lt.s32.totalorder %s1859_s29, 4  ;;  %p1960_p10 = por %p202_p7, %p41_p0 }
  0x13   : > { %p1964_p11 = por %p208_p8, %p47_p3  ;;  %s1969_s16 = sand.u32 1, %s1855_s28  }
  0x14   : > { %s2485_s14 = scalar_select %p1960_p10, 1, 0 }
  0x15   : > { %s2486_s15 = scalar_select %p1964_p11, 1, 0 }
  0x16   : > { %s1573_s17 = sshll.u32 %s1859_s29, 6  ;;  %s1406_s18 = sshll.u32 %s1969_s16, 2 }
  0x17   : > { %s1978_s21 = scalar_lea.hbm %s2473_s0, %s1573_s17  ;;  %s247_s22 = scalar_lea.vmem [#allocation3], %s1406_s18 }
  0x18   : > { %s255_s23 = sshll.u32 %s247_s22, 4  ;;  %p1984_p12 = pnand %p1689_p9, %p1950_p5  ;;  %s1988_s23 = int_to_ptr.vmem [resolvable:$true] %s255_s23 }
  0x19   : > { %s244_s25 = scalar_lea.sflag [#allocation4], %s1969_s16  ;;  %s1729_s30 = scalar_lea.hbm %s1978_s21, 64 }
  0x1a   : > { %p1730_p1 = scmp.ne.s32.totalorder %s1978_s21, %s1729_s30  ;;  %p1731_p2 = pneg %p1984_p12 }
  0x1b   : > { %s1734_s12 = scalar_lea.hbm %s2473_s0, 256  ;;  %p1735_p5 = scmp.lt.u32.totalorder %s1978_s21, %s2473_s0 }
  0x1c   : > { %p1732_p3 = pnand %p1731_p2, %p1730_p1  ;;  %p1736_p7 = scmp.lt.u32.totalorder %s1734_s12, %s1729_s30 }
  0x1d   : > { %p1738_p9 = scmp.lt.u32.totalorder %s1729_s30, %s1978_s21 }
  0x1e   : > { %p1733_p4 = pneg %p1732_p3  ;;  %p1737_p8 = por %p1736_p7, %p1735_p5 }
  0x20   : > { %p1739_p13 = por %p1738_p9, %p1737_p8 }
  0x22   : > { %p1740_p0 = pnand %p1739_p13, %p1733_p4 }
  0x24   : > { %1743 = shalt.err (!%p1740_p0)
}
  0x25   : > { %s1744_s22 = scalar_lea.vmem %s1988_s23, 64  ;;  %s1861_s9 = smov [#allocation3]  }
  0x26   : > { %p1745_p1 = scmp.ne.s32.totalorder %s1988_s23, %s1744_s22  ;;  %s1749_s10 = sshll.u32 %s1861_s9, 4  ;;  %s1750_s10 = int_to_ptr.vmem [resolvable:$false] %s1749_s10 }
  0x27   : > { %s1751_s19 = scalar_lea.vmem %s1750_s10, 128  ;;  %p1752_p10 = scmp.lt.s32.totalorder %s1988_s23, %s1750_s10 }
  0x28   : > { %p1747_p3 = pnand %p1745_p1, %p1731_p2  ;;  %p1753_p5 = scmp.lt.s32.totalorder %s1751_s19, %s1744_s22 }
  0x2a   : > { %p1748_p11 = pneg %p1747_p3  ;;  %p1754_p7 = por %p1753_p5, %p1752_p10 }
  0x2c   : > { %p1755_p8 = pnand %p1754_p7, %p1748_p11 }
  0x2e   : > { %1758 = shalt.err (!%p1755_p8)
}
  0x2f   : > { %1681 = dma.hbm_to_vmem [thread:$0]  (!%p1984_p12), %s1978_s21, 64, %s1988_s23, %s244_s25  }
  0x30   : > { %p2488_p13 = scmp.lt.s32.totalorder %s1859_s29, 5  ;;  %p2489_p0 = scmp.ge.s32.totalorder %s1859_s29, 1 }
  0x31   : > { %s2031_s22 = scalar_lea.hbm %s2474_s1, %s1573_s17  ;;  %s266_s9 = scalar_lea.vmem [#allocation6], %s1406_s18 }
  0x32   : > { %p2022_p4 = pnand %p2489_p0, %p2488_p13  ;;  %s274_s10 = sshll.u32 %s266_s9, 4  ;;  %s275_s10 = int_to_ptr.vmem [resolvable:$true] %s274_s10 }
  0x33   : > { %s263_s21 = scalar_lea.sflag [#allocation7], %s1969_s16  ;;  %s1759_s23 = scalar_lea.hbm %s2031_s22, 64 }
  0x34   : > { %s2490_s30 = scalar_select %p2022_p4, 1, 0 }
  0x35   : > { %p1760_p10 = scmp.ne.s32.totalorder %s2031_s22, %s1759_s23  ;;  %s1764_s17 = scalar_lea.hbm %s2474_s1, 256 }
  0x36   : > { %p1765_p1 = scmp.lt.u32.totalorder %s2031_s22, %s2474_s1  ;;  %p1766_p3 = scmp.lt.u32.totalorder %s1764_s17, %s1759_s23 }
  0x37   : > { %p1762_p11 = pnand %p1760_p10, %p1731_p2  ;;  %p1768_p7 = scmp.lt.u32.totalorder %s1759_s23, %s2031_s22 }
  0x38   : > { %p1767_p5 = por %p1766_p3, %p1765_p1 }
  0x39   : > { %p1763_p9 = pneg %p1762_p11 }
  0x3a   : > { %p1769_p8 = por %p1768_p7, %p1767_p5 }
  0x3c   : > { %p1770_p13 = pnand %p1769_p8, %p1763_p9 }
  0x3e   : > { %1773 = shalt.err (!%p1770_p13)
}
  0x3f   : > { %s1774_s16 = scalar_lea.vmem %s275_s10, 64  ;;  %s1862_s18 = smov [#allocation6]  }
  0x40   : > { %p1775_p0 = scmp.ne.s32.totalorder %s275_s10, %s1774_s16  ;;  %s1779_s9 = sshll.u32 %s1862_s18, 4  ;;  %s1780_s9 = int_to_ptr.vmem [resolvable:$false] %s1779_s9 }
  0x41   : > { %s1781_s25 = scalar_lea.vmem %s1780_s9, 128  ;;  %p1782_p6 = scmp.lt.s32.totalorder %s275_s10, %s1780_s9 }
  0x42   : > { %p1777_p10 = pnand %p1775_p0, %p1731_p2  ;;  %p1783_p4 = scmp.lt.s32.totalorder %s1781_s25, %s1774_s16 }
  0x44   : > { %p1778_p11 = pneg %p1777_p10  ;;  %p1784_p1 = por %p1783_p4, %p1782_p6 }
  0x46   : > { %p1785_p3 = pnand %p1784_p1, %p1778_p11 }
  0x48   : > { %1788 = shalt.err (!%p1785_p3)
}
  0x49   : > { %1684 = dma.hbm_to_vmem [thread:$0]  (!%p1984_p12), %s2031_s22, 64, %s275_s10, %s263_s21  }
  0x4a   : > { %p2491_p9 = scmp.ne.s32.totalorder %s2490_s30, 0 }
  0x4b   : > { %s2058_s23 = sand.u32 (!%p2491_p9), 1, %s1851_s27   ;;  %p2492_p6 = scmp.ne.s32.totalorder (!%p2491_p9), %s2484_s13, 0 }
  0x4c   : > { %283 = sbr.rel (%p2491_p9) target bundleno = 630 (0x276), region = 48  ;;  %s2061_s19 = sshll.u32 (!%p2491_p9), %s2058_s23, 2 }
  0x4d   : > { %s286_s17 = scalar_lea.sflag (!%p2491_p9), [#allocation4], %s2058_s23  ;;  %s289_s12 = scalar_lea.vmem (!%p2491_p9), [#allocation3], %s2061_s19 }
  0x53   : > { %1834 = dma.done.wait (%p2492_p6), %s286_s17, 64  }
  0x54   : > { %1836 = vsyncadd (%p2492_p6), %s286_s17, 4294967232  ;;  %s295_s24 = scalar_lea.sflag [#allocation7], %s2058_s23  ;;  %s298_s30 = scalar_lea.vmem [#allocation6], %s2061_s19 }
  0x55   : > { %1838 = dma.done.wait (%p2492_p6), %s295_s24, 64  }
  0x56   : > { %1840 = vsyncadd (%p2492_p6), %s295_s24, 4294967232  ;;  %v337_v0 = vlaneseq  ;;  %v1863_v1 = vmov 0.0   ;;  %v346_v8 = vld [vmem:[%s289_s12] sm:$0xf]  ;;  %v1864_v15 = vmov 1.0|1.0  }
  0x57   : > { %653 = vmatprep.mubr.f32.mxu0 %v1863_v1  ;;  %742 = vmatprep.mubr.f32.mxu1 %v1863_v1  ;;  %v459_v20 = vld [vmem:[%s298_s30] sm:$0xf]  ;;  %v2229_v25 = vld [vmem:[%s2475_s2] sm:$0xff]  ;;  %v574_v27 = vld [vmem:[%s2475_s2 + $0x10] sm:$0xff]  ;;  %v1865_v31 = vmov 0   ;;  %s1255_s18 = sld [smem:[#allocation2]] }
  0x58   : > { %v2078_v2 = vshrl.u32 %v337_v0, 7  ;;  %v2258_v26 = vld [vmem:[%s2475_s2 + $0x8] sm:$0xff]  ;;  %v575_v28 = vld [vmem:[%s2475_s2 + $0x18] sm:$0xff]  ;;  %v949_v29 = vld [vmem:[%s2477_s4] sm:$0xff]  ;;  %1727 = vset.pattern.permute.xlu0 %v1865_v31  ;;  %1728 = vset.pattern.permute.xlu1 %v1865_v31  ;;  %s1575_s9 = sshll.u32 %s1932_s6, 6  ;;  %s333_s25 = scalar_lea.vmem [#allocation8], %s2061_s19 }
  0x59   : > { %v951_v30 = vld [vmem:[%s2477_s4 + $0x10] sm:$0xff]  ;;  %955 = vperm.xlu0 %1727, %v949_v29   ;;  %v950_v32 = vld [vmem:[%s2477_s4 + $0x8] sm:$0xff]  ;;  %v952_v33 = vld [vmem:[%s2477_s4 + $0x18] sm:$0xff]  ;;  %s1310_s17 = sshll.u32 %s333_s25, 4  ;;  %s2430_s30 = scalar_lea.hbm %s2480_s7, %s1575_s9  ;;  %s2432_s17 = int_to_ptr.vmem [resolvable:$true] %s1310_s17 }
  0x5a   : > { %v353_v3 = vsub.s32 1, %v2078_v2  ;;  %v361_v4 = vsub.s32 3, %v2078_v2  ;;  %v349_v5 = vsub.s32 0, %v2078_v2  ;;  %v357_v6 = vsub.s32 2, %v2078_v2  ;;  %965 = vperm.xlu1 %1728, %v951_v30   ;;  %v1179_v34 = vld [vmem:[%s2478_s5] sm:$0xff]  ;;  %v1180_v35 = vld [vmem:[%s2478_s5 + $0x8] sm:$0xff] }
  0x5b   : > { %v2085_v7 = vadd.s32 8, %v2078_v2  ;;  %v2088_v9 = vadd.s32 16, %v2078_v2  ;;  %v2091_v10 = vadd.s32 24, %v2078_v2  ;;  %v2131_v16 = vadd.s32 32, %v2078_v2  ;;  %v1181_v36 = vld [vmem:[%s2478_s5 + $0x10] sm:$0xff]  ;;  %v1182_v37 = vld [vmem:[%s2478_s5 + $0x18] sm:$0xff] }
  0x5c   : > { %v2095_v11 = vrot.slane %v346_v8, %v353_v3  ;;  %v2099_v12 = vrot.slane %v346_v8, %v361_v4  ;;  %v2103_v13 = vrot.slane %v346_v8, %v349_v5  ;;  %v2107_v14 = vrot.slane %v346_v8, %v357_v6  ;;  %s1296_s13 = scalar_lea.sflag [#allocation5], %s2058_s23  ;;  %s1789_s22 = scalar_lea.vmem %s2432_s17, 64 }
  0x5d   : > { %v2134_v17 = vadd.s32 40, %v2078_v2  ;;  %v2157_v18 = vadd.s32 48, %v2078_v2  ;;  %v2160_v19 = vadd.s32 56, %v2078_v2  ;;  %v2186_v21 = vrot.slane %v459_v20, %v353_v3  ;;  %960 = vperm.xlu0 %1727, %v950_v32   ;;  %p1790_p12 = scmp.ne.s32.totalorder %s2432_s17, %s1789_s22  ;;  %p2493_p2 = scmp.ne.s32.totalorder %s2485_s14, 0 }
  0x5e   : > { %vm364_vm0 = vcmp.eq.s32.totalorder %v2078_v2, %v2095_v11  ;;  %vm368_vm1 = vcmp.eq.s32.totalorder %v2085_v7, %v2095_v11  ;;  %vm366_vm2 = vcmp.eq.s32.totalorder %v2078_v2, %v2099_v12  ;;  %vm370_vm3 = vcmp.eq.s32.totalorder %v2085_v7, %v2099_v12  ;;  %970 = vperm.xlu1 %1728, %v952_v33   ;;  %s1867_s6 = smov [#allocation8]  }
  0x5f   : > { %vm1576_vm4 = vmpackc.low %vm368_vm1, %vm364_vm0  ;;  %vm363_vm5 = vcmp.eq.s32.totalorder %v2078_v2, %v2103_v13  ;;  %vm367_vm6 = vcmp.eq.s32.totalorder %v2085_v7, %v2103_v13  ;;  %vm365_vm7 = vcmp.eq.s32.totalorder %v2078_v2, %v2107_v14  ;;  %vm369_vm8 = vcmp.eq.s32.totalorder %v2085_v7, %v2107_v14  ;;  %p1791_p4 = pnand %p1790_p12, %p2493_p2  ;;  %s1793_s19 = sshll.u32 %s1867_s6, 4  ;;  %s1794_s19 = int_to_ptr.vmem [resolvable:$false] %s1793_s19 }
  0x60   : > { %1577 = vmatprep.subr.msk.bf16.mxu0 %vm1576_vm4, %v1864_v15  ;;  %vm1592_vm9 = vmpackc.low %vm370_vm3, %vm366_vm2  ;;  %vm372_vm10 = vcmp.eq.s32.totalorder %v2088_v9, %v2095_v11  ;;  %vm376_vm11 = vcmp.eq.s32.totalorder %v2091_v10, %v2095_v11  ;;  %vm374_vm13 = vcmp.eq.s32.totalorder %v2088_v9, %v2099_v12  ;;  %vm378_vm14 = vcmp.eq.s32.totalorder %v2091_v10, %v2099_v12  ;;  %s1795_s10 = scalar_lea.vmem %s1794_s19, 128  ;;  %p1796_p7 = scmp.lt.s32.totalorder %s2432_s17, %s1794_s19 }
  0x61   : > { %1593 = vmatprep.subr.msk.bf16.mxu1 %vm1592_vm9, %v1864_v15  ;;  %vm1578_vm12 = vmpackc.low %vm367_vm6, %vm363_vm5  ;;  %vm371_vm0 = vcmp.eq.s32.totalorder %v2088_v9, %v2103_v13  ;;  %vm375_vm1 = vcmp.eq.s32.totalorder %v2091_v10, %v2103_v13  ;;  %vm373_vm3 = vcmp.eq.s32.totalorder %v2088_v9, %v2107_v14  ;;  %vm377_vm4 = vcmp.eq.s32.totalorder %v2091_v10, %v2107_v14  ;;  %p1792_p5 = pneg %p1791_p4  ;;  %p1797_p8 = scmp.lt.s32.totalorder %s1795_s10, %s1789_s22 }
  0x62   : > { %1579 = vmatpush1.bf16.msk.msra.mxu0 %vm1578_vm12, %v1864_v15  ;;  %vm1594_vm15 = vmpackc.low %vm369_vm8, %vm365_vm7  ;;  %vm380_vm6 = vcmp.eq.s32.totalorder %v2131_v16, %v2095_v11  ;;  %vm384_vm7 = vcmp.eq.s32.totalorder %v2134_v17, %v2095_v11  ;;  %vm382_vm9 = vcmp.eq.s32.totalorder %v2131_v16, %v2099_v12  ;;  %vm379_vm12 = vcmp.eq.s32.totalorder %v2131_v16, %v2103_v13 }
  0x63   : > { %1595 = vmatpush1.bf16.msk.msra.mxu1 %vm1594_vm15, %v1864_v15  ;;  %vm1580_vm2 = vmpackc.low %vm376_vm11, %vm372_vm10  ;;  %vm386_vm10 = vcmp.eq.s32.totalorder %v2134_v17, %v2099_v12  ;;  %vm381_vm15 = vcmp.eq.s32.totalorder %v2131_v16, %v2107_v14  ;;  %v2195_v22 = vrot.slane %v459_v20, %v361_v4  ;;  %v2204_v23 = vrot.slane %v459_v20, %v349_v5  ;;  %p1798_p13 = por %p1797_p8, %p1796_p7 }
  0x64   : > { %1581 = vmatprep.subr.msk.bf16.mxu0 %vm1580_vm2, %v1864_v15  ;;  %vm1596_vm5 = vmpackc.low %vm378_vm14, %vm374_vm13  ;;  %vm383_vm13 = vcmp.eq.s32.totalorder %v2134_v17, %v2103_v13  ;;  %vm388_vm2 = vcmp.eq.s32.totalorder %v2157_v18, %v2095_v11  ;;  %v2213_v24 = vrot.slane %v459_v20, %v357_v6  ;;  %1185 = vperm.xlu0 %1727, %v1179_v34  }
  0x65   : > { %1597 = vmatprep.subr.msk.bf16.mxu1 %vm1596_vm5, %v1864_v15  ;;  %vm1582_vm8 = vmpackc.low %vm375_vm1, %vm371_vm0  ;;  %vm385_vm0 = vcmp.eq.s32.totalorder %v2134_v17, %v2107_v14  ;;  %vm390_vm5 = vcmp.eq.s32.totalorder %v2157_v18, %v2099_v12  ;;  %1190 = vperm.xlu1 %1728, %v1180_v35   ;;  %p1799_p0 = pnand %p1798_p13, %p1792_p5 }
  0x66   : > { %1583 = vmatpush1.bf16.msk.msra.mxu0 %vm1582_vm8, %v1864_v15  ;;  %vm1598_vm11 = vmpackc.low %vm377_vm4, %vm373_vm3  ;;  %vm392_vm3 = vcmp.eq.s32.totalorder %v2160_v19, %v2095_v11  ;;  %vm387_vm8 = vcmp.eq.s32.totalorder %v2157_v18, %v2103_v13 }
  0x67   : > { %1599 = vmatpush1.bf16.msk.msra.mxu1 %vm1598_vm11, %v1864_v15  ;;  %vm1584_vm14 = vmpackc.low %vm384_vm7, %vm380_vm6  ;;  %vm394_vm6 = vcmp.eq.s32.totalorder %v2160_v19, %v2099_v12  ;;  %vm389_vm11 = vcmp.eq.s32.totalorder %v2157_v18, %v2107_v14 }
  0x68   : > { %1585 = vmatprep.subr.msk.bf16.mxu0 %vm1584_vm14, %v1864_v15  ;;  %vm1600_vm1 = vmpackc.low %vm386_vm10, %vm382_vm9  ;;  %vm391_vm9 = vcmp.eq.s32.totalorder %v2160_v19, %v2103_v13  ;;  %vm477_vm14 = vcmp.eq.s32.totalorder %v2078_v2, %v2186_v21  ;;  %1195 = vperm.xlu0 %1727, %v1181_v36  }
  0x69   : > { %1601 = vmatprep.subr.msk.bf16.mxu1 %vm1600_vm1, %v1864_v15  ;;  %vm1586_vm4 = vmpackc.low %vm383_vm13, %vm379_vm12  ;;  %vm393_vm12 = vcmp.eq.s32.totalorder %v2160_v19, %v2107_v14  ;;  %vm479_vm1 = vcmp.eq.s32.totalorder %v2078_v2, %v2195_v22  ;;  %1200 = vperm.xlu1 %1728, %v1182_v37  }
  0x6a   : > { %1587 = vmatpush1.bf16.msk.msra.mxu0 %vm1586_vm4, %v1864_v15  ;;  %vm1602_vm7 = vmpackc.low %vm385_vm0, %vm381_vm15  ;;  %vm481_vm15 = vcmp.eq.s32.totalorder %v2085_v7, %v2186_v21  ;;  %vm576_vm4 = vcmask 523264  }
  0x6b   : > { %1603 = vmatpush1.bf16.msk.msra.mxu1 %vm1602_vm7, %v1864_v15  ;;  %vm1588_vm10 = vmpackc.low %vm392_vm3, %vm388_vm2  ;;  %vm483_vm2 = vcmp.eq.s32.totalorder %v2085_v7, %v2195_v22 }
  0x6c   : > { %1589 = vmatprep.subr.msk.bf16.mxu0 %vm1588_vm10, %v1864_v15  ;;  %vm1604_vm13 = vmpackc.low %vm394_vm6, %vm390_vm5  ;;  %vm476_vm5 = vcmp.eq.s32.totalorder %v2078_v2, %v2204_v23  ;;  %vm480_vm6 = vcmp.eq.s32.totalorder %v2085_v7, %v2204_v23 }
  0x6d   : > { %1605 = vmatprep.subr.msk.bf16.mxu1 %vm1604_vm13, %v1864_v15  ;;  %vm1590_vm0 = vmpackc.low %vm391_vm9, %vm387_vm8  ;;  %vm478_vm8 = vcmp.eq.s32.totalorder %v2078_v2, %v2213_v24  ;;  %vm482_vm9 = vcmp.eq.s32.totalorder %v2085_v7, %v2213_v24 }
  0x6e   : > { %1591 = vmatpush1.bf16.msk.msra.mxu0 %vm1590_vm0, %v1864_v15  ;;  %vm1606_vm3 = vmpackc.low %vm393_vm12, %vm389_vm11  ;;  %vm485_vm11 = vcmp.eq.s32.totalorder %v2088_v9, %v2186_v21  ;;  %vm489_vm12 = vcmp.eq.s32.totalorder %v2091_v10, %v2186_v21 }
  0x6f   : > { %1607 = vmatpush1.bf16.msk.msra.mxu1 %vm1606_vm3, %v1864_v15  ;;  %vm1608_vm7 = vmpackc.low %vm481_vm15, %vm477_vm14  ;;  %vm487_vm14 = vcmp.eq.s32.totalorder %v2088_v9, %v2195_v22  ;;  %vm491_vm15 = vcmp.eq.s32.totalorder %v2091_v10, %v2195_v22 }
  0x70   : > { %1609 = vmatprep.subr.msk.bf16.mxu0 %vm1608_vm7, %v1864_v15  ;;  %vm1624_vm10 = vmpackc.low %vm483_vm2, %vm479_vm1  ;;  %vm484_vm1 = vcmp.eq.s32.totalorder %v2088_v9, %v2204_v23  ;;  %vm488_vm2 = vcmp.eq.s32.totalorder %v2091_v10, %v2204_v23 }
  0x71   : > { %1496 = vmatmul.mubr.msk.f32.vlgmr.msra.gmra.mrb[0].mxu0 %vm576_vm4, %v2229_v25  ;;  %1625 = vmatprep.subr.msk.bf16.mxu1 %vm1624_vm10, %v1864_v15  ;;  %vm1610_vm13 = vmpackc.low %vm480_vm6, %vm476_vm5  ;;  %vm486_vm5 = vcmp.eq.s32.totalorder %v2088_v9, %v2213_v24  ;;  %vm490_vm6 = vcmp.eq.s32.totalorder %v2091_v10, %v2213_v24 }
  0x72   : > { %1516 = vmatmul.mubr.msk.f32.vlgmr.msra.gmra.mrb[0].mxu1 %vm576_vm4, %v2229_v25  ;;  %1611 = vmatpush1.bf16.msk.msra.mxu0 %vm1610_vm13, %v1864_v15  ;;  %vm1626_vm0 = vmpackc.low %vm482_vm9, %vm478_vm8  ;;  %vm493_vm8 = vcmp.eq.s32.totalorder %v2131_v16, %v2186_v21  ;;  %vm497_vm9 = vcmp.eq.s32.totalorder %v2134_v17, %v2186_v21 }
  0x73   : > { %1627 = vmatpush1.bf16.msk.msra.mxu1 %vm1626_vm0, %v1864_v15  ;;  %659 = vmatprep.mubr.f32.mxu0 %v1863_v1  ;;  %vm1612_vm3 = vmpackc.low %vm489_vm12, %vm485_vm11  ;;  %vm495_vm11 = vcmp.eq.s32.totalorder %v2131_v16, %v2195_v22  ;;  %vm499_vm12 = vcmp.eq.s32.totalorder %v2134_v17, %v2195_v22 }
  0x74   : > { %748 = vmatprep.mubr.f32.mxu1 %v1863_v1  ;;  %1613 = vmatprep.subr.msk.bf16.mxu0 %vm1612_vm3, %v1864_v15  ;;  %vm1628_vm7 = vmpackc.low %vm491_vm15, %vm487_vm14  ;;  %vm492_vm14 = vcmp.eq.s32.totalorder %v2131_v16, %v2204_v23  ;;  %vm496_vm15 = vcmp.eq.s32.totalorder %v2134_v17, %v2204_v23 }
  0x75   : > { %1497 = vmatmul.mubr.msk.f32.gmra.mrb[2].mxu0 %vm576_vm4, %v2258_v26  ;;  %1629 = vmatprep.subr.msk.bf16.mxu1 %vm1628_vm7, %v1864_v15  ;;  %vm1614_vm10 = vmpackc.low %vm488_vm2, %vm484_vm1  ;;  %vm494_vm1 = vcmp.eq.s32.totalorder %v2131_v16, %v2213_v24  ;;  %vm498_vm2 = vcmp.eq.s32.totalorder %v2134_v17, %v2213_v24 }
  0x76   : > { %1517 = vmatmul.mubr.msk.f32.gmra.mrb[2].mxu1 %vm576_vm4, %v2258_v26  ;;  %1615 = vmatpush1.bf16.msk.msra.mxu0 %vm1614_vm10, %v1864_v15  ;;  %vm1630_vm13 = vmpackc.low %vm490_vm6, %vm486_vm5  ;;  %vm501_vm5 = vcmp.eq.s32.totalorder %v2157_v18, %v2186_v21  ;;  %vm505_vm6 = vcmp.eq.s32.totalorder %v2160_v19, %v2186_v21 }
  0x77   : > { %1631 = vmatpush1.bf16.msk.msra.mxu1 %vm1630_vm13, %v1864_v15  ;;  %665 = vmatprep.mubr.f32.mxu0 %v1863_v1  ;;  %vm1616_vm0 = vmpackc.low %vm497_vm9, %vm493_vm8  ;;  %vm503_vm8 = vcmp.eq.s32.totalorder %v2157_v18, %v2195_v22  ;;  %vm507_vm9 = vcmp.eq.s32.totalorder %v2160_v19, %v2195_v22 }
  0x78   : > { %754 = vmatprep.mubr.f32.mxu1 %v1863_v1  ;;  %1617 = vmatprep.subr.msk.bf16.mxu0 %vm1616_vm0, %v1864_v15  ;;  %vm1632_vm3 = vmpackc.low %vm499_vm12, %vm495_vm11  ;;  %vm500_vm11 = vcmp.eq.s32.totalorder %v2157_v18, %v2204_v23  ;;  %vm504_vm12 = vcmp.eq.s32.totalorder %v2160_v19, %v2204_v23 }
  0x79   : > { %1498 = vmatmul.mubr.msk.f32.gmra.mrb[4].mxu0 %vm576_vm4, %v574_v27  ;;  %1633 = vmatprep.subr.msk.bf16.mxu1 %vm1632_vm3, %v1864_v15  ;;  %vm1618_vm7 = vmpackc.low %vm496_vm15, %vm492_vm14  ;;  %vm502_vm14 = vcmp.eq.s32.totalorder %v2157_v18, %v2213_v24  ;;  %vm506_vm15 = vcmp.eq.s32.totalorder %v2160_v19, %v2213_v24 }
  0x7a   : > { %1518 = vmatmul.mubr.msk.f32.gmra.mrb[4].mxu1 %vm576_vm4, %v574_v27  ;;  %1619 = vmatpush1.bf16.msk.msra.mxu0 %vm1618_vm7, %v1864_v15  ;;  %vm1634_vm10 = vmpackc.low %vm498_vm2, %vm494_vm1 }
  0x7b   : > { %1635 = vmatpush1.bf16.msk.msra.mxu1 %vm1634_vm10, %v1864_v15  ;;  %671 = vmatprep.mubr.f32.mxu0 %v1863_v1  ;;  %vm1620_vm13 = vmpackc.low %vm505_vm6, %vm501_vm5 }
  0x7c   : > { %760 = vmatprep.mubr.f32.mxu1 %v1863_v1  ;;  %1621 = vmatprep.subr.msk.bf16.mxu0 %vm1620_vm13, %v1864_v15  ;;  %vm1636_vm0 = vmpackc.low %vm507_vm9, %vm503_vm8 }
  0x7d   : > { %1499 = vmatmul.mubr.msk.f32.gmra.mrb[6].mxu0 %vm576_vm4, %v575_v28  ;;  %1637 = vmatprep.subr.msk.bf16.mxu1 %vm1636_vm0, %v1864_v15  ;;  %vm1622_vm1 = vmpackc.low %vm504_vm12, %vm500_vm11 }
  0x7e   : > { %1519 = vmatmul.mubr.msk.f32.gmra.mrb[6].mxu1 %vm576_vm4, %v575_v28  ;;  %1623 = vmatpush1.bf16.msk.msra.mxu0 %vm1622_vm1, %v1864_v15  ;;  %vm1638_vm2 = vmpackc.low %vm506_vm15, %vm502_vm14 }
  0x7f   : > { %1639 = vmatpush1.bf16.msk.msra.mxu1 %vm1638_vm2, %v1864_v15  ;;  %831 = vmatprep.mubr.f32.mxu0 %v1863_v1 }
  0x80   : > { %920 = vmatprep.mubr.f32.mxu1 %v1863_v1 }
  0x81   : > { %1536 = vmatmul.mubr.msk.f32.vlgmr.msra.gmra.mrb[8].mxu0 %vm576_vm4, %v2229_v25 }
  0x82   : > { %1556 = vmatmul.mubr.msk.f32.vlgmr.msra.gmra.mrb[8].mxu1 %vm576_vm4, %v2229_v25  ;;  %837 = vmatprep.mubr.f32.mxu0 %v1863_v1  ;;  %v945_v25 = vld [vmem:[%s2476_s3] sm:$0xff] }
  0x83   : > { %926 = vmatprep.mubr.f32.mxu1 %v1863_v1 }
  0x85   : > { %1537 = vmatmul.mubr.msk.f32.gmra.mrb[10].mxu0 %vm576_vm4, %v2258_v26 }
  0x86   : > { %1557 = vmatmul.mubr.msk.f32.gmra.mrb[10].mxu1 %vm576_vm4, %v2258_v26  ;;  %843 = vmatprep.mubr.f32.mxu0 %v1863_v1  ;;  %v946_v26 = vld [vmem:[%s2476_s3 + $0x8] sm:$0xff] }
  0x87   : > { %932 = vmatprep.mubr.f32.mxu1 %v1863_v1 }
  0x89   : > { %1538 = vmatmul.mubr.msk.f32.gmra.mrb[12].mxu0 %vm576_vm4, %v574_v27 }
  0x8a   : > { %1558 = vmatmul.mubr.msk.f32.gmra.mrb[12].mxu1 %vm576_vm4, %v574_v27  ;;  %849 = vmatprep.mubr.f32.mxu0 %v1863_v1  ;;  %v947_v27 = vld [vmem:[%s2476_s3 + $0x10] sm:$0xff] }
  0x8b   : > { %938 = vmatprep.mubr.f32.mxu1 %v1863_v1 }
  0x8d   : > { %1539 = vmatmul.mubr.msk.f32.gmra.mrb[14].mxu0 %vm576_vm4, %v575_v28 }
  0x8e   : > { %1559 = vmatmul.mubr.msk.f32.gmra.mrb[14].mxu1 %vm576_vm4, %v575_v28  ;;  %1049 = vmatprep.mubr.f32.mxu0 %v1863_v1  ;;  %v948_v28 = vld [vmem:[%s2476_s3 + $0x18] sm:$0xff] }
  0x8f   : > { %1138 = vmatprep.mubr.f32.mxu1 %v1863_v1 }
  0xd8   : > { %v956_v29 = vpop.permute.xlu0 %955 }
  0xd9   : > { %v966_v30 = vpop.permute.xlu1 %965 }
  0xdc   : > { %v961_v31 = vpop.permute.xlu0 %960 }
  0xdd   : > { %v971_v36 = vpop.permute.xlu1 %970 }
 0x144   : > { %v655_v38 = vpop.f32.mrb[0].mxu0 }
 0x145   : > { %v744_v39 = vpop.f32.mrb[0].mxu1  ;;  %v657_v40 = vpop.f32.mrb[1].mxu0 }
 0x146   : > { %v746_v41 = vpop.f32.mrb[1].mxu1 }
 0x148   : > { %v661_v42 = vpop.f32.mrb[2].mxu0 }
 0x149   : > { %v1642_v43 = vpack.c.bf16 %v661_v42, %v655_v38  ;;  %v750_v44 = vpop.f32.mrb[2].mxu1  ;;  %v663_v45 = vpop.f32.mrb[3].mxu0 }
 0x14a   : > { %v1658_v46 = vpack.c.bf16 %v750_v44, %v744_v39  ;;  %v1640_v47 = vpack.c.bf16 %v663_v45, %v657_v40  ;;  %v752_v48 = vpop.f32.mrb[3].mxu1 }
 0x14b   : > { %v1656_v49 = vpack.c.bf16 %v752_v48, %v746_v41  ;;  %v1186_v48 = vpop.permute.xlu0 %1185 }
 0x14c   : > { %v667_v50 = vpop.f32.mrb[4].mxu0  ;;  %1641 = vmatprep.subr.bf16.mxu0 %v1640_v47 }
 0x14d   : > { %v756_v51 = vpop.f32.mrb[4].mxu1  ;;  %1657 = vmatprep.subr.bf16.mxu1 %v1656_v49  ;;  %v669_v52 = vpop.f32.mrb[5].mxu0  ;;  %1643 = vmatpush1.bf16.msra.mxu0 %v1642_v43 }
 0x14e   : > { %v758_v53 = vpop.f32.mrb[5].mxu1  ;;  %1659 = vmatpush1.bf16.msra.mxu1 %v1658_v46 }
 0x150   : > { %v673_v54 = vpop.f32.mrb[6].mxu0 }
 0x151   : > { %v1646_v55 = vpack.c.bf16 %v673_v54, %v667_v50  ;;  %v762_v56 = vpop.f32.mrb[6].mxu1  ;;  %v675_v57 = vpop.f32.mrb[7].mxu0 }
 0x152   : > { %v1662_v58 = vpack.c.bf16 %v762_v56, %v756_v51  ;;  %v1644_v59 = vpack.c.bf16 %v675_v57, %v669_v52  ;;  %v764_v60 = vpop.f32.mrb[7].mxu1  ;;  %v1191_v57 = vpop.permute.xlu1 %1190 }
 0x153   : > { %v1660_v61 = vpack.c.bf16 %v764_v60, %v758_v53 }
 0x154   : > { %v833_v62 = vpop.f32.mrb[8].mxu0  ;;  %1645 = vmatprep.subr.bf16.mxu0 %v1644_v59 }
 0x155   : > { %v922_v63 = vpop.f32.mrb[8].mxu1  ;;  %1661 = vmatprep.subr.bf16.mxu1 %v1660_v61  ;;  %v835_v3 = vpop.f32.mrb[9].mxu0  ;;  %1647 = vmatpush1.bf16.msra.mxu0 %v1646_v55 }
 0x156   : > { %v924_v4 = vpop.f32.mrb[9].mxu1  ;;  %1663 = vmatpush1.bf16.msra.mxu1 %v1662_v58 }
 0x158   : > { %v839_v5 = vpop.f32.mrb[10].mxu0 }
 0x159   : > { %v1650_v6 = vpack.c.bf16 %v839_v5, %v833_v62  ;;  %v928_v7 = vpop.f32.mrb[10].mxu1  ;;  %v841_v8 = vpop.f32.mrb[11].mxu0 }
 0x15a   : > { %v1666_v9 = vpack.c.bf16 %v928_v7, %v922_v63  ;;  %v1648_v10 = vpack.c.bf16 %v841_v8, %v835_v3  ;;  %v930_v11 = vpop.f32.mrb[11].mxu1 }
 0x15b   : > { %v1664_v12 = vpack.c.bf16 %v930_v11, %v924_v4 }
 0x15c   : > { %v845_v13 = vpop.f32.mrb[12].mxu0  ;;  %1649 = vmatprep.subr.bf16.mxu0 %v1648_v10 }
 0x15d   : > { %v934_v14 = vpop.f32.mrb[12].mxu1  ;;  %1665 = vmatprep.subr.bf16.mxu1 %v1664_v12  ;;  %v847_v15 = vpop.f32.mrb[13].mxu0  ;;  %1651 = vmatpush1.bf16.msra.mxu0 %v1650_v6 }
 0x15e   : > { %v936_v16 = vpop.f32.mrb[13].mxu1  ;;  %1667 = vmatpush1.bf16.msra.mxu1 %v1666_v9 }
 0x160   : > { %v851_v17 = vpop.f32.mrb[14].mxu0 }
 0x161   : > { %v1654_v18 = vpack.c.bf16 %v851_v17, %v845_v13  ;;  %v940_v19 = vpop.f32.mrb[14].mxu1  ;;  %v853_v20 = vpop.f32.mrb[15].mxu0 }
 0x162   : > { %v1670_v21 = vpack.c.bf16 %v940_v19, %v934_v14  ;;  %v1652_v22 = vpack.c.bf16 %v853_v20, %v847_v15  ;;  %v942_v23 = vpop.f32.mrb[15].mxu1  ;;  %v1196_v15 = vpop.permute.xlu0 %1195 }
 0x163   : > { %v1668_v24 = vpack.c.bf16 %v942_v23, %v936_v16 }
 0x164   : > { %1653 = vmatprep.subr.bf16.mxu0 %v1652_v22 }
 0x165   : > { %1669 = vmatprep.subr.bf16.mxu1 %v1668_v24  ;;  %1655 = vmatpush1.bf16.msra.mxu0 %v1654_v18 }
 0x166   : > { %1671 = vmatpush1.bf16.msra.mxu1 %v1670_v21 }
 0x168   : > { %1560 = vmatmul.mubr.msk.f32.vlgmr.msra.gmra.mrb[16].mxu0 %vm576_vm4, %v945_v25 }
 0x169   : > { %1564 = vmatmul.mubr.msk.f32.vlgmr.msra.gmra.mrb[16].mxu1 %vm576_vm4, %v945_v25  ;;  %1055 = vmatprep.mubr.f32.mxu0 %v1863_v1 }
 0x16a   : > { %1144 = vmatprep.mubr.f32.mxu1 %v1863_v1 }
 0x16c   : > { %1561 = vmatmul.mubr.msk.f32.gmra.mrb[18].mxu0 %vm576_vm4, %v946_v26 }
 0x16d   : > { %1565 = vmatmul.mubr.msk.f32.gmra.mrb[18].mxu1 %vm576_vm4, %v946_v26  ;;  %1061 = vmatprep.mubr.f32.mxu0 %v1863_v1 }
 0x16e   : > { %1150 = vmatprep.mubr.f32.mxu1 %v1863_v1 }
 0x170   : > { %1562 = vmatmul.mubr.msk.f32.gmra.mrb[20].mxu0 %vm576_vm4, %v947_v27 }
 0x171   : > { %1566 = vmatmul.mubr.msk.f32.gmra.mrb[20].mxu1 %vm576_vm4, %v947_v27  ;;  %1067 = vmatprep.mubr.f32.mxu0 %v1863_v1 }
 0x172   : > { %1156 = vmatprep.mubr.f32.mxu1 %v1863_v1 }
 0x174   : > { %1563 = vmatmul.mubr.msk.f32.gmra.mrb[22].mxu0 %vm576_vm4, %v948_v28 }
 0x175   : > { %1567 = vmatmul.mubr.msk.f32.gmra.mrb[22].mxu1 %vm576_vm4, %v948_v28  ;;  %vm1292_vm4 = vcmp.lt.s32.totalorder %v337_v0, 512 }
 0x23b   : > { %v1051_v32 = vpop.f32.mrb[16].mxu0 }
 0x23c   : > { %v1052_v33 = vadd.f32 %v1051_v32, %v956_v29  ;;  %v1140_v34 = vpop.f32.mrb[16].mxu1  ;;  %v1053_v35 = vpop.f32.mrb[17].mxu0 }
 0x23d   : > { %v1141_v37 = vadd.f32 %v1140_v34, %v956_v29  ;;  %v1054_v38 = vadd.f32 %v1053_v35, %v956_v29  ;;  %v1142_v39 = vpop.f32.mrb[17].mxu1 }
 0x23e   : > { %v1163_v40 = vmax.f32 %v1052_v33, 0.0  ;;  %v1143_v41 = vadd.f32 %v1142_v39, %v956_v29 }
 0x23f   : > { %v1165_v42 = vmax.f32 %v1141_v37, 0.0  ;;  %v1164_v43 = vmax.f32 %v1054_v38, 0.0  ;;  %v1057_v1 = vpop.f32.mrb[18].mxu0  ;;  %v1201_v37 = vpop.permute.xlu1 %1200 }
 0x240   : > { %v1166_v44 = vmax.f32 %v1143_v41, 0.0  ;;  %v1058_v45 = vadd.f32 %v1057_v1, %v961_v31  ;;  %v1146_v46 = vpop.f32.mrb[18].mxu1  ;;  %v1059_v47 = vpop.f32.mrb[19].mxu0  ;;  %v1203_v52 = vmul.f32 %v1186_v48, %v1163_v40 }
 0x241   : > { %v1147_v49 = vadd.f32 %v1146_v46, %v961_v31  ;;  %v1060_v50 = vadd.f32 %v1059_v47, %v961_v31  ;;  %v1148_v51 = vpop.f32.mrb[19].mxu1  ;;  %v1205_v55 = vmul.f32 %v1186_v48, %v1165_v42  ;;  %v1204_v56 = vmul.f32 %v1186_v48, %v1164_v43 }
 0x242   : > { %v1167_v53 = vmax.f32 %v1058_v45, 0.0  ;;  %v1149_v54 = vadd.f32 %v1148_v51, %v961_v31  ;;  %v1206_v61 = vmul.f32 %v1186_v48, %v1166_v44 }
 0x243   : > { %v1169_v58 = vmax.f32 %v1147_v49, 0.0  ;;  %v1168_v59 = vmax.f32 %v1060_v50, 0.0  ;;  %v1063_v60 = vpop.f32.mrb[20].mxu0 }
 0x244   : > { %v1207_v62 = vmul.f32 %v1191_v57, %v1167_v53  ;;  %v1170_v63 = vmax.f32 %v1149_v54, 0.0  ;;  %v1064_v3 = vadd.f32 %v1063_v60, %v966_v30  ;;  %v1152_v4 = vpop.f32.mrb[20].mxu1  ;;  %v1065_v5 = vpop.f32.mrb[21].mxu0 }
 0x245   : > { %v1209_v6 = vmul.f32 %v1191_v57, %v1169_v58  ;;  %v1208_v7 = vmul.f32 %v1191_v57, %v1168_v59  ;;  %v1153_v8 = vadd.f32 %v1152_v4, %v966_v30  ;;  %v1066_v9 = vadd.f32 %v1065_v5, %v966_v30  ;;  %v1154_v10 = vpop.f32.mrb[21].mxu1 }
 0x246   : > { %v1219_v11 = vadd.f32 %v1207_v62, %v1203_v52  ;;  %v1210_v12 = vmul.f32 %v1191_v57, %v1170_v63  ;;  %v1171_v13 = vmax.f32 %v1064_v3, 0.0  ;;  %v1155_v14 = vadd.f32 %v1154_v10, %v966_v30 }
 0x247   : > { %v1237_v16 = vadd.f32 %v1209_v6, %v1205_v55  ;;  %v1228_v17 = vadd.f32 %v1208_v7, %v1204_v56  ;;  %v1173_v18 = vmax.f32 %v1153_v8, 0.0  ;;  %v1172_v19 = vmax.f32 %v1066_v9, 0.0  ;;  %v1069_v20 = vpop.f32.mrb[22].mxu0 }
 0x248   : > { %v1246_v21 = vadd.f32 %v1210_v12, %v1206_v61  ;;  %v1211_v22 = vmul.f32 %v1196_v15, %v1171_v13  ;;  %v1174_v23 = vmax.f32 %v1155_v14, 0.0  ;;  %v1070_v24 = vadd.f32 %v1069_v20, %v971_v36  ;;  %v1158_v25 = vpop.f32.mrb[22].mxu1  ;;  %v1071_v26 = vpop.f32.mrb[23].mxu0 }
 0x249   : > { %v1213_v27 = vmul.f32 %v1196_v15, %v1173_v18  ;;  %v1212_v28 = vmul.f32 %v1196_v15, %v1172_v19  ;;  %v1159_v29 = vadd.f32 %v1158_v25, %v971_v36  ;;  %v1072_v31 = vadd.f32 %v1071_v26, %v971_v36  ;;  %v1160_v32 = vpop.f32.mrb[23].mxu1 }
 0x24a   : > { %v1220_v33 = vadd.f32 %v1219_v11, %v1211_v22  ;;  %v1214_v34 = vmul.f32 %v1196_v15, %v1174_v23  ;;  %v1175_v30 = vmax.f32 %v1070_v24, 0.0  ;;  %v1161_v35 = vadd.f32 %v1160_v32, %v971_v36 }
 0x24b   : > { %v1238_v38 = vadd.f32 %v1237_v16, %v1213_v27  ;;  %v1229_v39 = vadd.f32 %v1228_v17, %v1212_v28  ;;  %v1177_v40 = vmax.f32 %v1159_v29, 0.0  ;;  %v1176_v41 = vmax.f32 %v1072_v31, 0.0 }
 0x24c   : > { %v1247_v42 = vadd.f32 %v1246_v21, %v1214_v34  ;;  %v1215_v43 = vmul.f32 %v1201_v37, %v1175_v30  ;;  %v1178_v1 = vmax.f32 %v1161_v35, 0.0  ;;  %v1866_v61 = vmov 1966171168  }
 0x24d   : > { %v1217_v44 = vmul.f32 %v1201_v37, %v1177_v40  ;;  %v1216_v45 = vmul.f32 %v1201_v37, %v1176_v41  ;;  %v1268_v62 = vunpack.c.l.s4 %v1866_v61  ;;  %v1256_v8 = vstv %s1255_s18 }
 0x24e   : > { %v1221_v46 = vadd.f32 %v1220_v33, %v1215_v43  ;;  %v1218_v47 = vmul.f32 %v1201_v37, %v1178_v1 }
 0x24f   : > { %v1239_v48 = vadd.f32 %v1238_v38, %v1217_v44  ;;  %v1230_v49 = vadd.f32 %v1229_v39, %v1216_v45  ;;  %v1269_v11 = vunpack.c.0.s8 %v1268_v62 }
 0x250   : > { %v1222_v50 = vrot.slane %v1221_v46, 4  ;;  %v1248_v51 = vadd.f32 %v1247_v42, %v1218_v47 }
 0x251   : > { %v1240_v52 = vrot.slane %v1239_v48, 4  ;;  %v1231_v53 = vrot.slane %v1230_v49, 4  ;;  %v1272_v20 = vsub.s32 %v1269_v11, %v2078_v2 }
 0x252   : > { %v1223_v36 = vadd.f32 %v1222_v50, %v1221_v46  ;;  %v1249_v54 = vrot.slane %v1248_v51, 4 }
 0x253   : > { %v1241_v55 = vadd.f32 %v1240_v52, %v1239_v48  ;;  %v1232_v56 = vadd.f32 %v1231_v53, %v1230_v49 }
 0x254   : > { %v1224_v57 = vrot.slane %v1223_v36, 2  ;;  %v1250_v58 = vadd.f32 %v1249_v54, %v1248_v51 }
 0x255   : > { %v1242_v59 = vrot.slane %v1241_v55, 2  ;;  %v1233_v60 = vrot.slane %v1232_v56, 2 }
 0x256   : > { %v1225_v63 = vadd.f32 %v1224_v57, %v1223_v36  ;;  %v1251_v3 = vrot.slane %v1250_v58, 2 }
 0x257   : > { %v1243_v4 = vadd.f32 %v1242_v59, %v1241_v55  ;;  %v1234_v5 = vadd.f32 %v1233_v60, %v1232_v56 }
 0x258   : > { %v1226_v6 = vrot.slane %v1225_v63, 1  ;;  %v1252_v7 = vadd.f32 %v1251_v3, %v1250_v58 }
 0x259   : > { %v1244_v9 = vrot.slane %v1243_v4, 1  ;;  %v1235_v10 = vrot.slane %v1234_v5, 1 }
 0x25a   : > { %v1227_v12 = vadd.f32 %v1226_v6, %v1225_v63  ;;  %v1253_v13 = vrot.slane %v1252_v7, 1 }
 0x25b   : > { %v1245_v14 = vadd.f32 %v1244_v9, %v1243_v4  ;;  %v1236_v15 = vadd.f32 %v1235_v10, %v1234_v5 }
 0x25c   : > { %v1257_v16 = vadd.f32 %v1256_v8, %v1227_v12  ;;  %v1254_v17 = vadd.f32 %v1253_v13, %v1252_v7 }
 0x25d   : > { %v1259_v18 = vadd.f32 %v1256_v8, %v1245_v14  ;;  %v1258_v19 = vadd.f32 %v1256_v8, %v1236_v15 }
 0x25e   : > { %v1260_v21 = vadd.f32 %v1256_v8, %v1254_v17 }
 0x25f   : > { %v1265_v22 = vcombine.low %v1257_v16, %v1258_v19 }
 0x260   : > { %v1266_v23 = vcombine.low %v1259_v18, %v1260_v21 }
 0x261   : > { %v1273_v24 = vrot.slane %v1265_v22, %v1272_v20 }
 0x262   : > { %v1280_v25 = vrot.slane %v1266_v23, %v1272_v20 }
 0x264   : > { %v1281_v26 = vcombine.low %v1273_v24, %v1280_v25 }
 0x266   : > { %v1288_v27 = vrot.slane %v1281_v26, %v1272_v20 }
 0x268   : > { %1294 = vst.msk [vmem:[%s333_s25] sm:$0xf] %vm1292_vm4, %v1288_v27 }
 0x269   : > { %1802 = shalt.err (!%p1799_p0)
}
 0x26a   : > { %s1803_s23 = scalar_lea.hbm %s2430_s30, 64  ;;  %s1807_s16 = scalar_lea.hbm %s2480_s7, 256 }
 0x26b   : > { %p1804_p10 = scmp.ne.s32.totalorder %s2430_s30, %s1803_s23  ;;  %p1808_p3 = scmp.lt.u32.totalorder %s2430_s30, %s2480_s7 }
 0x26c   : > { %p1809_p9 = scmp.lt.u32.totalorder %s1807_s16, %s1803_s23  ;;  %p1811_p12 = scmp.lt.u32.totalorder %s1803_s23, %s2430_s30 }
 0x26d   : > { %p1805_p11 = pnand %p1804_p10, %p2493_p2 }
 0x26e   : > { %p1810_p6 = por %p1809_p9, %p1808_p3 }
 0x26f   : > { %p1806_p1 = pneg %p1805_p11 }
 0x270   : > { %p1812_p4 = por %p1811_p12, %p1810_p6 }
 0x272   : > { %p1813_p5 = pnand %p1812_p4, %p1806_p1 }
 0x274   : > { %1816 = shalt.err (!%p1813_p5)
}
 0x275   : > { %1676 = dma.vmem_to_hbm [thread:$0]  (%p2493_p2), %s2432_s17, 64, %s2430_s30, %s1296_s13  }
 0x276 PF: > { %p1690_p7 = scmp.ge.s32.totalorder %s1859_s29, 2  ;;  %s1322_s25 = sand.u32 1, %s1847_s26  }
 0x277   : > { %p2494_p8 = scmp.ne.s32.totalorder %s2486_s15, 0  ;;  %s1323_s12 = scalar_lea.sflag [#allocation5], %s1322_s25 }
 0x279   : > { %p1686_p13 = pnand %p1690_p7, %p2494_p8 }
 0x27b   : > { %1842 = dma.done.wait (!%p1686_p13), %s1323_s12, 64  }
 0x27c   : > { %1844 = vsyncadd (!%p1686_p13), %s1323_s12, 4294967232  ;;  %p24_p0 = scmp.ge.s32.totalorder %s1936_s8, 6   ;;  %s2495_s26 = smov %s1851_s27 }
 0x27d   : > { %s2496_s27 = smov %s1855_s28  ;;  %s2497_s28 = smov %s1948_s11 }
 0x27e   : > { %s2498_s29 = smov %s1936_s8  ;;  %26 = sbr.rel (!%p24_p0) target bundleno = 9 (0x9), region = 106 }
 0x285   :  { %1328 = vsyncpa [#allocation4], 1 }
 0x286   :  { %1330 = vsyncpa [#allocation4 + $0x1], 1 }
 0x287   :  { %1331 = vsyncpa [#allocation7], 1 }
 0x288   :  { %1333 = vsyncpa [#allocation7 + $0x1], 1 }
 0x289   :  { %1334 = vsyncpa [#allocation5], 1 }
 0x28a   :  { %1336 = vsyncpa [#allocation5 + $0x1], 1 }

</bundles_post_ra>
